<compile_context>
chip_gen: v7x
topology: tpu7x:2x2x1
jax: 0.10.0
libtpu: 0.0.40
codegen_flags: <defaults>
</compile_context>

<pallas_src>
import math

import jax
import jax.numpy as jnp
from jax.experimental import pallas as pl
from jax.experimental.pallas import tpu as pltpu

PAD_INDEX = 0  # the torch module references a module-level PAD_INDEX constant; pick 0


def make_sinusoidal_table(num_embeddings: int, embedding_dim: int) -> jnp.ndarray:
    """Deterministic init matching torch __init__ (learnable=False branch)."""
    position = jnp.arange(num_embeddings, dtype=jnp.float32)[:, None]            # (N, 1)
    div_term = jnp.exp(
        jnp.arange(0, embedding_dim, 2, dtype=jnp.float32)
        * (-math.log(10000.0) / embedding_dim)
    )                                                                             # (D/2,)
    ang = position * div_term                                                     # (N, D/2)
    table = jnp.zeros((num_embeddings, embedding_dim), jnp.float32)
    table = table.at[:, 0::2].set(jnp.sin(ang))
    table = table.at[:, 1::2].set(jnp.cos(ang))
    return table


def _pos_emb_kernel(gate_ref, emb_ref, o_ref):
    """One (tb, tt, D) output tile.

    gate_ref: (tb, tt, 1) bfloat16  1.0 where (token == PAD_INDEX and t >= left_padding),
                                    0.0 otherwise (torch keeps emb only at PAD tokens).
    emb_ref : (tt, D)     float32   positional rows, pre-shifted by left_padding
                                    (rows t < left_padding are exactly zero).
    o_ref   : (tb, tt, D) out dtype
    """
    gate = gate_ref[...].astype(jnp.float32)                      # (tb, tt, 1)
    # (1, tt, D) * (tb, tt, 1) -> (tb, tt, D); lane-broadcast only, no cross-lane relayout.
    o_ref[...] = (emb_ref[...][None, :, :] * gate).astype(o_ref.dtype)


def positional_embedding(x, table, left_padding=0, *, out_dtype=jnp.float32,
                         tb=None, tt=None):
    """x: (B, T) integer tokens.  table: (N, D) float.  Returns (B, T, D) out_dtype."""
    B, T = x.shape
    N, D = table.shape

    # Validate only when left_padding is a concrete Python int (traced values are allowed).
    if isinstance(left_padding, int):
        if not (0 <= left_padding <= T):
            raise ValueError(f"left_padding={left_padding} must be in [0, {T}]")
        if T - left_padding > N:
            raise ValueError(
                f"time_step after slicing ({T - left_padding}) exceeds num_embeddings ({N})")

    lp = jnp.asarray(left_padding, jnp.int32)
    t_idx = jnp.arange(T, dtype=jnp.int32)
    in_body = t_idx >= lp                                                         # (T,)

    # Fused F.pad + time shift: row t of emb_full is table[t - left_padding] for
    # t >= left_padding and exactly zero otherwise.  Built with a gather + where so
    # left_padding can be a runtime value (no recompile per padding).
    src = jnp.clip(t_idx - lp, 0, N - 1)
    emb_full = jnp.where(in_body[:, None], table.astype(jnp.float32)[src], 0.0)   # (T, D)

    # Per-(b, t) gate, bf16 {0,1}.  Trailing singleton keeps time on sublanes in-kernel so
    # the broadcast over D is a pure lane-broadcast; bf16 halves the 128-lane padding cost.
    gate = jnp.logical_and(x == PAD_INDEX, in_body[None, :]) \
              .astype(jnp.bfloat16)[:, :, None]                                   # (B, T, 1)

    # --- VMEM budget -----------------------------------------------------------------
    try:
        vmem_cap = int(pltpu.get_tpu_info().vmem_capacity_bytes)
    except Exception:
        vmem_cap = 64 * 1024 * 1024          # conservative (v7x per-core physical VMEM)
    vmem_limit = max(4 * 1024 * 1024, min(vmem_cap // 2, 64 * 1024 * 1024))
    vmem_budget = int(vmem_limit * 0.8)      # headroom for compiler scratch / semaphores

    # --- tile selection ----------------------------------------------------------------
    out_esize = jnp.dtype(out_dtype).itemsize
    if tb is None:
        tb = B if B <= 32 else 32            # coarse batch tile: fewer grid steps / DMAs
    tb = max(1, min(tb, B))
    if tt is None:
        # Per-grid-step VMEM with default double-buffering (2 buffers per spec), per unit tt:
        #   out : 2 * tb * D * out_esize
        #   gate: 2 * tb * 128 * 2        (bf16; size-1 lane dim padded to 128 lanes)
        #   emb : 2 * D * 4
        per_tt = 2 * tb * D * out_esize + 2 * tb * 128 * 2 + 2 * D * 4
        tt_budget = max(16, vmem_budget // per_tt)
        tt_cap = max(16, (8 * 1024 * 1024) // (tb * D * out_esize))   # ~8 MiB output tile
        tt = min(int(tt_budget), int(tt_cap))
        if tt >= T:
            tt = T
        else:
            tt = max(16, (tt // 16) * 16)    # multiple of 16: safe sublane block for bf16
    tt = max(1, min(tt, T))

    # Batch innermost -> the emb tile's block index is constant across the inner axis,
    # so Pallas keeps it resident (one table DMA per time tile, reused across the batch).
    grid = (pl.cdiv(T, tt), pl.cdiv(B, tb))

    out = pl.pallas_call(
        _pos_emb_kernel,
        out_shape=jax.ShapeDtypeStruct((B, T, D), out_dtype),
        grid=grid,
        in_specs=[
            pl.BlockSpec((tb, tt, 1), lambda ti, bi: (bi, ti, 0)),   # gate
            pl.BlockSpec((tt, D), lambda ti, bi: (ti, 0)),           # shifted pos table
        ],
        out_specs=pl.BlockSpec((tb, tt, D), lambda ti, bi: (bi, ti, 0)),
        compiler_params=pltpu.CompilerParams(
            # Both axes parallel so v7x's two TensorCores can split the grid (no-op on
            # v5e/v6e).  If profiling shows the inner batch axis being split (losing the
            # emb-tile reuse per core), switch to ("parallel", "arbitrary").
            dimension_semantics=("parallel", "parallel"),
            vmem_limit_bytes=vmem_limit,
        ),
    )(gate, emb_full)
    return out


def reference(x, table, left_padding=0):
    """Pure-JAX reference mirroring the torch forward exactly."""
    x_sl = x[:, left_padding:]
    Tp = x.shape[1] - left_padding
    emb = table[:Tp][None, :, :].astype(jnp.float32)
    keep = (x_sl == PAD_INDEX)[:, :, None]
    out = jnp.where(keep, emb, 0.0)
    return jnp.pad(out, ((0, 0), (left_padding, 0), (0, 0)))


if __name__ == "__main__":
    key = jax.random.PRNGKey(0)
    k1, k2 = jax.random.split(key)
    embedding_dim = 128                      # D multiple of 128 -> lane-dense stores

    # --- test 1: small shapes, single-tile grid, left_padding > 0 -------------------
    num_embeddings = 16
    B, T, lp = 2, 8, 2
    table = make_sinusoidal_table(num_embeddings, embedding_dim)
    x = jax.random.randint(k1, (B, T), minval=0, maxval=4, dtype=jnp.int32)  # PAD appears

    out = jax.block_until_ready(positional_embedding(x, table, left_padding=lp))
    ref = reference(x, table, left_padding=lp)
    assert out.shape == (B, T, embedding_dim) and out.dtype == jnp.float32
    assert jnp.allclose(out, ref, atol=1e-6), "test1: mismatch vs pure-JAX reference"

    # --- test 2: multi-tile grid (forced tb/tt) exercising both index-map axes -------
    num_embeddings2 = 64
    B2, T2, lp2 = 2, 32, 3
    table2 = make_sinusoidal_table(num_embeddings2, embedding_dim)
    x2 = jax.random.randint(k2, (B2, T2), minval=0, maxval=4, dtype=jnp.int32)

    out2 = jax.block_until_ready(
        positional_embedding(x2, table2, left_padding=lp2, tb=1, tt=16)   # grid = (2, 2)
    )
    ref2 = reference(x2, table2, left_padding=lp2)
    assert jnp.allclose(out2, ref2, atol=1e-6), "test2: mismatch vs pure-JAX reference"

    # --- test 3: left_padding = 0 edge case + runtime (traced-style) left_padding ----
    out3 = jax.block_until_ready(positional_embedding(x2, table2, left_padding=0))
    ref3 = reference(x2, table2, left_padding=0)
    assert jnp.allclose(out3, ref3, atol=1e-6), "test3: mismatch vs pure-JAX reference"

    out3b = jax.block_until_ready(
        positional_embedding(x2, table2, left_padding=jnp.int32(lp2))     # runtime scalar
    )
    assert jnp.allclose(out3b, ref2, atol=1e-6), "test3b: mismatch with runtime left_padding"

    # --- test 4: bf16 output path (halves HBM write bytes for bf16 consumers) --------
    out4 = jax.block_until_ready(
        positional_embedding(x2, table2, left_padding=lp2, out_dtype=jnp.bfloat16)
    )
    assert out4.dtype == jnp.bfloat16
    assert jnp.allclose(out4.astype(jnp.float32), ref2.astype(jnp.bfloat16).astype(jnp.float32),
                        atol=1e-2), "test4: mismatch vs bf16-cast reference"

    print("KERNEL_OK")
</pallas_src>

<mosaic_0001>
module attributes {stable_mosaic.version = 11 : i64} {
  func.func @_pos_emb_kernel(%arg0: i32, %arg1: i32, %arg2: memref<2x8x1xbf16, #tpu.memory_space<vmem>>, %arg3: memref<8x128xf32, #tpu.memory_space<vmem>>, %arg4: memref<2x8x128xf32, #tpu.memory_space<vmem>>) attributes {dimension_semantics = [#tpu.dimension_semantics<parallel>, #tpu.dimension_semantics<parallel>], iteration_bounds = array<i64: 1, 1>, scalar_prefetch = 0 : i64, scratch_operands = 0 : i64, tpu.core_type = #tpu.core_type<tc>, window_params = [{transform_indices = @transform_0, window_bounds = array<i64: 2, 8, 1>}, {transform_indices = @transform_1, window_bounds = array<i64: 8, 128>}, {transform_indices = @transform_2, window_bounds = array<i64: 2, 8, 128>}]} {
    %c0 = arith.constant 0 : index
    %c0_0 = arith.constant 0 : index
    %c0_1 = arith.constant 0 : index
    %0 = vector.load %arg2[%c0, %c0_0, %c0_1] : memref<2x8x1xbf16, #tpu.memory_space<vmem>>, vector<2x8x1xbf16>
    %1 = arith.extf %0 : vector<2x8x1xbf16> to vector<2x8x1xf32>
    %c0_2 = arith.constant 0 : index
    %c0_3 = arith.constant 0 : index
    %2 = vector.load %arg3[%c0_2, %c0_3] : memref<8x128xf32, #tpu.memory_space<vmem>>, vector<8x128xf32>
    %3 = vector.shape_cast %2 : vector<8x128xf32> to vector<1x8x128xf32>
    %4 = vector.broadcast %3 : vector<1x8x128xf32> to vector<2x8x128xf32>
    %5 = vector.broadcast %1 : vector<2x8x1xf32> to vector<2x8x128xf32>
    %6 = arith.mulf %4, %5 : vector<2x8x128xf32>
    %c0_4 = arith.constant 0 : index
    %c0_5 = arith.constant 0 : index
    %c0_6 = arith.constant 0 : index
    %7 = vector.load %arg4[%c0_4, %c0_5, %c0_6] : memref<2x8x128xf32, #tpu.memory_space<vmem>>, vector<2x8x128xf32>
    tpu.vector_store %arg4[%c0_4, %c0_5, %c0_6], %6 {strides = array<i32>} : memref<2x8x128xf32, #tpu.memory_space<vmem>>, vector<2x8x128xf32>,
    return
  }
  func.func @transform_0(%arg0: i32, %arg1: i32) -> (i32, i32, i32) {
    %c0_i32 = arith.constant 0 : i32
    %c0_i32_0 = arith.constant 0 : i32
    return %arg1, %arg0, %c0_i32 : i32, i32, i32
  }
  func.func @transform_1(%arg0: i32, %arg1: i32) -> (i32, i32) {
    %c0_i32 = arith.constant 0 : i32
    %c0_i32_0 = arith.constant 0 : i32
    return %arg0, %c0_i32 : i32, i32
  }
  func.func @transform_2(%arg0: i32, %arg1: i32) -> (i32, i32, i32) {
    %c0_i32 = arith.constant 0 : i32
    %c0_i32_0 = arith.constant 0 : i32
    return %arg1, %arg0, %c0_i32 : i32, i32, i32
  }
}

</mosaic_0001>

<bundles_post_ra>
// kernel: tpu_custom_call.1
= control target key start
LH: loop header
LB: loop body
LE: loop exit
PB: predicated region body
PF: predicated region fallthrough
CT: control target
= control target key end

     0   :  { %s122_s0 = inlined_call_operand.vmem [shape: bf16[2,8,1], index: 0, kind: input, shape index: {}]   ;;  %s123_s1 = inlined_call_operand.vmem [shape: f32[8,128], index: 1, kind: input, shape index: {}]   ;;  %s124_s2 = inlined_call_operand.hbm [shape: f32[2,8,128], index: 2, kind: output, shape index: {}]  }
   0x1   :  { %v48_v0 = vld [vmem:[%s122_s0] sm:$0xff]  }
   0x2   :  { %7 = vsyncpa [#allocation3], 0  ;;  %v85_v1 = vmov 0   ;;  %v49_v2 = vunpack.c.l.bf16 %v48_v0  ;;  %v50_v3 = vunpack.c.h.bf16 %v48_v0  ;;  %s86_s11 = smov [#allocation2]   ;;  %v16_v5 = vld [vmem:[%s123_s1] sm:$0xff] }
   0x3   :  { %55 = vset.pattern.permute.xlu0 %v85_v1  ;;  %s36_s12 = sshll.u32 %s86_s11, 4  ;;  %s37_s12 = int_to_ptr.vmem [resolvable:$true] %s36_s12 }
   0x4   :  { %v56_v4 = vpack.i.bf16 %v50_v3, %v49_v2  ;;  %s61_s0 = scalar_lea.vmem %s37_s12, 256  ;;  %p66_p1 = scmp.lt.s32.totalorder %s37_s12, %s37_s12 }
   0x5   :  { %p62_p0 = scmp.ne.s32.totalorder %s37_s12, %s61_s0  ;;  %p67_p2 = scmp.lt.s32.totalorder %s61_s0, %s61_s0 }
   0x6   :  { %57 = vperm.xlu0 %55, %v56_v4  }
   0x7   :  { %p68_p3 = por %p67_p2, %p66_p1 }
   0x9   :  { %p69_p4 = pnand %p68_p3, %p62_p0 }
  0x85   :  { %v58_v6 = vpop.permute.xlu0 %57 }
  0x86   :  { %v60_v7 = vunpack.i.h.bf16 %v58_v6  ;;  %v59_v8 = vunpack.i.l.bf16 %v58_v6 }
  0x88   :  { %v28_v9 = vmul.f32 %v60_v7, %v16_v5  ;;  %v27_v10 = vmul.f32 %v59_v8, %v16_v5 }
  0x8a   :  { %30 = vst [vmem:[#allocation2 + $0x8] sm:$0xff] %v28_v9  ;;  %29 = vst [vmem:[#allocation2] sm:$0xff] %v27_v10 }
  0x8b   :  { %72 = shalt.err (!%p69_p4)
}
  0x8c   :  { %s73_s17 = scalar_lea.hbm %s124_s2, 256 }
  0x8d   :  { %p74_p5 = scmp.ne.s32.totalorder %s124_s2, %s73_s17  ;;  %p77_p6 = scmp.lt.u32.totalorder %s73_s17, %s124_s2 }
  0x8f   :  { %p79_p7 = pnand %p77_p6, %p74_p5 }
  0x91   :  { %82 = shalt.err (!%p79_p7)
}
  0x92   :  { %s87_s21 = smov 128   ;;  %s88_s22 = smov 8  }
  0x93   :  { %42 = dma.vmem_to_hbm [thread:$0]  %s37_s12, 256, %s124_s2, [#allocation3], %s87_s21, %s87_s21, %s88_s22  }
  0x94   :  { %83 = dma.done.wait [#allocation3], 256  }
  0x95   :  { %84 = vsyncadd [#allocation3], 4294967040 }
  0x96   :  { %46 = vsyncpa [#allocation3], 1 }

</bundles_post_ra>
